<compile_context>
chip_gen: v6e
topology: v6e:2x2x1
jax: 0.10.0
libtpu: 0.0.40
codegen_flags: <defaults>
</compile_context>

<pallas_src>
import jax
import jax.numpy as jnp
from jax.experimental import pallas as pl
from jax.experimental.pallas import tpu as pltpu


def _resnet_classifier_kernel(x_ref, wt_ref, b_ref, o_ref, acc_ref):
    # x_ref : (TB, C, TS)       -- activations, native layout (S chunk on lanes)
    # wt_ref: (C, N_pad) f32    -- classifier weight, pre-transposed, 1/S folded in
    # b_ref : (1, N_pad) f32    -- classifier bias (zero-padded)
    # o_ref : (TB, N_pad) f32   -- padded logits (lane-dense store)
    # acc_ref:(TB, C) f32       -- running spatial sum across the S grid axis
    s = pl.program_id(1)

    @pl.when(s == 0)
    def _init():
        acc_ref[...] = jnp.zeros_like(acc_ref)

    # Partial spatial pool over this S chunk; widen to f32 inside the reduce
    # (no full f32 copy of the tile is materialized).
    acc_ref[...] += jnp.sum(x_ref[...], axis=-1, dtype=jnp.float32)   # (TB, C)

    @pl.when(s == pl.num_programs(1) - 1)
    def _finalize():
        logits = jnp.dot(acc_ref[...], wt_ref[...],
                         preferred_element_type=jnp.float32)          # (TB, N_pad)
        o_ref[...] = logits + b_ref[...]                              # bias bcast


def _round_up(x, m):
    return ((x + m - 1) // m) * m


def _vmem_plan(C, n_pad):
    """Per-generation VMEM plan -> (vmem_limit_bytes, per-buffer x budget)."""
    try:
        cap = pltpu.get_tpu_info().vmem_capacity_bytes
    except Exception:  # conservative fallback (v7x per-core VMEM)
        cap = 64 * 1024 * 1024
    if cap >= 128 * 1024 * 1024:        # v5e / v6e: 128 MiB physical VMEM
        limit = 64 * 1024 * 1024
        x_cap = 12 * 1024 * 1024
    else:                               # v7x: 64 MiB physical -- stay well under
        limit = 48 * 1024 * 1024
        x_cap = 10 * 1024 * 1024
    # Account for the resident classifier params + headroom for output/acc/
    # compiler scratch, then halve for double-buffering of the x tile.
    w_bytes = _round_up(C, 8) * n_pad * 4
    b_bytes = 8 * n_pad * 4
    headroom = 4 * 1024 * 1024
    budget = min(x_cap, max(1 << 20, (limit - w_bytes - b_bytes - headroom) // 2))
    return limit, budget


def _choose_tiles(B, C, S, itemsize, budget):
    """Pick (batch_tile, s_tile) such that:
       - they divide B and S exactly (no jnp.pad HBM copy of x),
       - the output block (TB, n_pad) is layout-legal (TB == B or TB % 8 == 0),
       - the x block (TB, C, TS) is layout-legal (TS == S or TS % 128 == 0),
       - a double-buffered x tile fits in `budget` bytes when possible."""
    c_sub = _round_up(C, 8)

    def xbytes(tb, ts):
        return tb * c_sub * _round_up(ts, 128) * itemsize

    tb_cands = [d for d in range(B, 0, -1)
                if B % d == 0 and (d == B or d % 8 == 0)]
    ts_cands = [S] + [d for d in range(S - (S % 128), 0, -128)
                      if d and d != S and S % d == 0]

    best = None
    for ts in ts_cands:                 # prefer full-S blocks (fewest grid steps)
        for tb in tb_cands:             # prefer the largest batch tile
            if xbytes(tb, ts) <= budget:
                best = (tb, ts)
                break
        if best is not None:
            break
    if best is None:
        # Nothing fits the per-buffer budget: take the smallest legal tile and
        # let the explicit vmem_limit absorb it.
        best = (tb_cands[-1], ts_cands[-1])

    tb, ts = best
    # If the whole problem collapses to a single grid step, split S (if it has
    # a legal 128-multiple divisor) so the DMA/compute pipeline overlaps.
    if (B // tb) * (S // ts) == 1:
        for t in ts_cands:
            if t < ts and xbytes(tb, t) <= budget:
                ts = t
                break
    return tb, ts


def resnet_classifier_forward(x_nchw, weight, bias, *, batch_tile=None, s_tile=None):
    """x_nchw: (B, C, H, W); weight: (n_class, C); bias: (n_class,).
    Activations may be bf16 (recommended) or f32; accumulation is always f32."""
    B, C, H, W = x_nchw.shape
    S = H * W
    n_class = weight.shape[0]
    n_pad = _round_up(n_class, 128)

    # Free view: keep the native (B, C, S) layout -- no transpose, no HBM copy.
    x_bcs = x_nchw.reshape(B, C, S)

    # Tiny classifier params: pre-transposed, 1/S-folded, lane-padded.
    w_t = weight.T.astype(jnp.float32) * (1.0 / jnp.float32(S))      # (C, n_class)
    w_t = jnp.pad(w_t, ((0, 0), (0, n_pad - n_class)))               # (C, n_pad)
    b2d = jnp.pad(bias.astype(jnp.float32).reshape(1, n_class),
                  ((0, 0), (0, n_pad - n_class)))                    # (1, n_pad)

    vmem_limit, x_budget = _vmem_plan(C, n_pad)
    if batch_tile is None or s_tile is None:
        tb, ts = _choose_tiles(B, C, S, x_bcs.dtype.itemsize, x_budget)
        batch_tile = batch_tile or tb
        s_tile = s_tile or ts

    grid = (B // batch_tile, S // s_tile)

    # Single-buffer the grid-invariant classifier params when they are large
    # enough for double-buffering to cost real VMEM; tiny params keep defaults.
    if w_t.size * w_t.dtype.itemsize > (1 << 20):
        w_spec = pl.BlockSpec((C, n_pad), lambda i, s: (0, 0),
                              pipeline_mode=pl.Buffered(1))
        b_spec = pl.BlockSpec((1, n_pad), lambda i, s: (0, 0),
                              pipeline_mode=pl.Buffered(1))
    else:
        w_spec = pl.BlockSpec((C, n_pad), lambda i, s: (0, 0))
        b_spec = pl.BlockSpec((1, n_pad), lambda i, s: (0, 0))

    cost = pl.CostEstimate(
        flops=int(B * C * S + 2 * B * C * n_class),
        transcendentals=0,
        bytes_accessed=int(x_bcs.size * x_bcs.dtype.itemsize
                           + w_t.size * 4 + b2d.size * 4 + B * n_pad * 4),
    )

    out = pl.pallas_call(
        _resnet_classifier_kernel,
        out_shape=jax.ShapeDtypeStruct((B, n_pad), jnp.float32),
        grid=grid,
        in_specs=[
            # x tiles march over (batch, spatial); weight/bias stay resident.
            pl.BlockSpec((batch_tile, C, s_tile), lambda i, s: (i, 0, s)),
            w_spec,
            b_spec,
        ],
        out_specs=pl.BlockSpec((batch_tile, n_pad), lambda i, s: (i, 0)),
        scratch_shapes=[pltpu.VMEM((batch_tile, C), jnp.float32)],
        compiler_params=pltpu.CompilerParams(
            # batch: pipelined / megacore-shardable; spatial: reduction.
            dimension_semantics=("parallel", "arbitrary"),
            vmem_limit_bytes=vmem_limit,
        ),
        cost_estimate=cost,
    )(x_bcs, w_t, b2d)

    # Strip lane padding of the class dim.
    return out[:, :n_class]


if __name__ == "__main__":
    # Small shapes consistent with the module: batch=2, len_feature=4, 16x16
    # spatial, n_class=8.
    B, C, H, W = 2, 4, 16, 16
    n_class = 8

    key = jax.random.PRNGKey(0)
    kx, kw, kb = jax.random.split(key, 3)

    x = jax.random.normal(kx, (B, C, H, W), dtype=jnp.float32)
    # Deterministic synthetic params (shapes match nn.Linear(len_feature, n_class)).
    bound = 1.0 / jnp.sqrt(jnp.float32(C))
    weight = jax.random.uniform(kw, (n_class, C), minval=-bound, maxval=bound,
                                dtype=jnp.float32)
    bias = jax.random.uniform(kb, (n_class,), minval=-bound, maxval=bound,
                              dtype=jnp.float32)

    out = resnet_classifier_forward(x, weight, bias)
    out = jax.block_until_ready(out)

    # Pure-JAX reference of the same semantics.
    ref = jnp.mean(x.reshape(B, C, -1), axis=-1) @ weight.T + bias
    assert out.shape == (B, n_class)
    assert jnp.allclose(out, ref, atol=1e-5, rtol=1e-5)

    print("KERNEL_OK")
</pallas_src>

<mosaic_0001>
module attributes {stable_mosaic.version = 11 : i64} {
  func.func @_resnet_classifier_kernel(%arg0: i32, %arg1: i32, %arg2: memref<2x4x128xf32, #tpu.memory_space<vmem>>, %arg3: memref<4x128xf32, #tpu.memory_space<vmem>>, %arg4: memref<1x128xf32, #tpu.memory_space<vmem>>, %arg5: memref<2x128xf32, #tpu.memory_space<vmem>>, %arg6: memref<2x4xf32, #tpu.memory_space<vmem>>) attributes {dimension_semantics = [#tpu.dimension_semantics<parallel>, #tpu.dimension_semantics<arbitrary>], iteration_bounds = array<i64: 1, 2>, scalar_prefetch = 0 : i64, scratch_operands = 1 : i64, tpu.core_type = #tpu.core_type<tc>, window_params = [{transform_indices = @transform_0, window_bounds = array<i64: 2, 4, 128>}, {pipeline_mode = #tpu.pipeline_mode<synchronous>, transform_indices = @transform_1, window_bounds = array<i64: 4, 128>}, {pipeline_mode = #tpu.pipeline_mode<synchronous>, transform_indices = @transform_2, window_bounds = array<i64: 1, 128>}, {transform_indices = @transform_3, window_bounds = array<i64: 2, 128>}]} {
    %c0_i32 = arith.constant 0 : i32
    %0 = arith.cmpi eq, %arg1, %c0_i32 : i32
    %1 = arith.extui %0 : i1 to i32
    %c0_i32_0 = arith.constant 0 : i32
    %2 = arith.cmpi ne, %1, %c0_i32_0 : i32
    scf.if %2 {
      %cst_8 = arith.constant 0.000000e+00 : f32
      %11 = vector.broadcast %cst_8 : f32 to vector<2x4xf32>
      %c0_9 = arith.constant 0 : index
      %c0_10 = arith.constant 0 : index
      %12 = vector.load %arg6[%c0_9, %c0_10] : memref<2x4xf32, #tpu.memory_space<vmem>>, vector<2x4xf32>
      tpu.vector_store %arg6[%c0_9, %c0_10], %11 {strides = array<i32>} : memref<2x4xf32, #tpu.memory_space<vmem>>, vector<2x4xf32>,
    } else {
    }
    %c0 = arith.constant 0 : index
    %c0_1 = arith.constant 0 : index
    %3 = vector.load %arg6[%c0, %c0_1] : memref<2x4xf32, #tpu.memory_space<vmem>>, vector<2x4xf32>
    %c0_2 = arith.constant 0 : index
    %c0_3 = arith.constant 0 : index
    %c0_4 = arith.constant 0 : index
    %4 = vector.load %arg2[%c0_2, %c0_3, %c0_4] : memref<2x4x128xf32, #tpu.memory_space<vmem>>, vector<2x4x128xf32>
    %cst = arith.constant dense<0.000000e+00> : vector<2x4xf32>
    %5 = vector.multi_reduction <add>, %4, %cst [2] : vector<2x4x128xf32> to vector<2x4xf32>
    %6 = arith.addf %3, %5 : vector<2x4xf32>
    %c0_5 = arith.constant 0 : index
    %c0_6 = arith.constant 0 : index
    %7 = vector.load %arg6[%c0_5, %c0_6] : memref<2x4xf32, #tpu.memory_space<vmem>>, vector<2x4xf32>
    tpu.vector_store %arg6[%c0_5, %c0_6], %6 {strides = array<i32>} : memref<2x4xf32, #tpu.memory_space<vmem>>, vector<2x4xf32>,
    %c1_i32 = arith.constant 1 : i32
    %8 = arith.cmpi eq, %arg1, %c1_i32 : i32
    %9 = arith.extui %8 : i1 to i32
    %c0_i32_7 = arith.constant 0 : i32
    %10 = arith.cmpi ne, %9, %c0_i32_7 : i32
    scf.if %10 {
      %c0_8 = arith.constant 0 : index
      %c0_9 = arith.constant 0 : index
      %11 = vector.load %arg6[%c0_8, %c0_9] : memref<2x4xf32, #tpu.memory_space<vmem>>, vector<2x4xf32>
      %c0_10 = arith.constant 0 : index
      %c0_11 = arith.constant 0 : index
      %12 = vector.load %arg3[%c0_10, %c0_11] : memref<4x128xf32, #tpu.memory_space<vmem>>, vector<4x128xf32>
      %cst_12 = arith.constant dense<0.000000e+00> : vector<2x128xf32>
      %13 = tpu.matmul %11, %12, %cst_12 {dimension_numbers = #tpu.dot_dimension_numbers<[1], [0], [0], [1], [0, 0, 1, 1], [], []>} : vector<2x4xf32>, vector<4x128xf32>, vector<2x128xf32> -> vector<2x128xf32>
      %c0_13 = arith.constant 0 : index
      %c0_14 = arith.constant 0 : index
      %14 = vector.load %arg4[%c0_13, %c0_14] : memref<1x128xf32, #tpu.memory_space<vmem>>, vector<1x128xf32>
      %15 = vector.broadcast %14 : vector<1x128xf32> to vector<2x128xf32>
      %16 = arith.addf %13, %15 : vector<2x128xf32>
      %c0_15 = arith.constant 0 : index
      %c0_16 = arith.constant 0 : index
      %17 = vector.load %arg5[%c0_15, %c0_16] : memref<2x128xf32, #tpu.memory_space<vmem>>, vector<2x128xf32>
      tpu.vector_store %arg5[%c0_15, %c0_16], %16 {strides = array<i32>} : memref<2x128xf32, #tpu.memory_space<vmem>>, vector<2x128xf32>,
    } else {
    }
    return
  }
  func.func @transform_0(%arg0: i32, %arg1: i32) -> (i32, i32, i32) {
    %c0_i32 = arith.constant 0 : i32
    %c0_i32_0 = arith.constant 0 : i32
    return %arg0, %c0_i32, %arg1 : i32, i32, i32
  }
  func.func @transform_1(%arg0: i32, %arg1: i32) -> (i32, i32) {
    %c0_i32 = arith.constant 0 : i32
    %c0_i32_0 = arith.constant 0 : i32
    %c0_i32_1 = arith.constant 0 : i32
    return %c0_i32, %c0_i32_0 : i32, i32
  }
  func.func @transform_2(%arg0: i32, %arg1: i32) -> (i32, i32) {
    %c0_i32 = arith.constant 0 : i32
    %c0_i32_0 = arith.constant 0 : i32
    %c0_i32_1 = arith.constant 0 : i32
    return %c0_i32, %c0_i32_0 : i32, i32
  }
  func.func @transform_3(%arg0: i32, %arg1: i32) -> (i32, i32) {
    %c0_i32 = arith.constant 0 : i32
    %c0_i32_0 = arith.constant 0 : i32
    return %arg0, %c0_i32 : i32, i32
  }
}

</mosaic_0001>

<bundles_post_ra>
// kernel: tpu_custom_call.1
= control target key start
LH: loop header
LB: loop body
LE: loop exit
PB: predicated region body
PF: predicated region fallthrough
CT: control target
= control target key end

     0   :  { %8 = vsyncpa [#allocation4], 0  ;;  %s827_s0 = inlined_call_operand.hbm [shape: f32[2,4,256], index: 0, kind: input, shape index: {}]   ;;  %s828_s1 = inlined_call_operand.hbm [shape: f32[4,128], index: 1, kind: input, shape index: {}]   ;;  %s829_s2 = inlined_call_operand.vmem [shape: f32[1,128], index: 2, kind: input, shape index: {}]   ;;  %s830_s3 = inlined_call_operand.hbm [shape: f32[2,128], index: 3, kind: output, shape index: {}]  }
   0x1   :  { %10 = vsyncpa [#allocation4 + $0x1], 0 }
   0x2   :  { %11 = vsyncpa [#allocation7], 0 }
   0x3   :  { %12 = vsyncpa [#allocation5], 0  ;;  %s690_s12 = smov 0   ;;  %s692_s13 = smov 0  }
   0x4   :  { %s694_s14 = smov 0   ;;  %s696_s15 = smov 0  }
   0x5   :  { %s698_s16 = smov 0   ;;  %s700_s17 = smov 0  }
   0x6 LB: > { %s419_s18 = sadd.s32 4294967295, %s659_s17   ;;  %s39_s19 = sadd.s32 1, %s647_s14  ;;  %s659_s17 = sphi %s700_s17, %s18_s17   ;;  %s655_s16 = sphi %s698_s16, %s845_s16   ;;  %s651_s15 = sphi %s696_s15, %s844_s15   ;;  %s647_s14 = sphi %s694_s14, %s843_s14   ;;  %s643_s13 = sphi %s692_s13, %s842_s13   ;;  %s639_s12 = sphi %s690_s12, %s841_s12  }
   0x7   : > { %p46_p0 = scmp.ne.s32.totalorder %s647_s14, %s643_s13  ;;  %p47_p1 = scmp.eq.s32.totalorder %s659_s17, 0 }
   0x8   : > { %p52_p2 = scmp.ne.s32.totalorder %s643_s13, %s639_s12  ;;  %p726_p3 = scmp.eq.s32.totalorder %s419_s18, 0 }
   0x9   : > { %p48_p4 = por %p47_p1, %p46_p0  ;;  %p420_p5 = scmp.ge.s32.totalorder %s659_s17, 1 }
   0xa   : > { %p733_p6 = por %p726_p3, %p52_p2  ;;  %p131_p7 = scmp.lt.s32.totalorder %s659_s17, 3 }
   0xb   : > { %s661_s23 = smov [#allocation6]   ;;  %p463_p10 = scmp.lt.s32.totalorder %s659_s17, 2 }
   0xc   : > { %s834_s21 = scalar_select %p733_p6, 1, 0 }
   0xd   : > { %p738_p8 = pnand %p420_p5, %p131_p7  ;;  %s144_s24 = sshll.u32 %s661_s23, 4  ;;  %s145_s24 = int_to_ptr.vmem [resolvable:$true] %s144_s24 }
   0xe   : > { %s158_s25 = sand.u32 1, %s647_s14   ;;  %p748_p12 = pnand %p463_p10, %p48_p4 }
   0xf   : > { %s835_s22 = scalar_select %p738_p8, 1, 0 }
  0x10   : > { %p454_p9 = pneg %p738_p8  ;;  %s534_s27 = scalar_lea.vmem %s145_s24, 64 }
  0x11   : > { %p535_p0 = scmp.ne.s32.totalorder %s145_s24, %s534_s27  ;;  %p542_p5 = scmp.lt.s32.totalorder %s145_s24, %s145_s24 }
  0x12   : > { %p455_p11 = pnand %p454_p9, %p726_p3  ;;  %p543_p7 = scmp.lt.s32.totalorder %s534_s27, %s534_s27 }
  0x14   : > { %p525_p13 = pneg %p455_p11  ;;  %p544_p6 = por %p543_p7, %p542_p5 }
  0x16   : > { %p537_p1 = pnand %p535_p0, %p525_p13 }
  0x18   : > { %p538_p2 = pneg %p537_p1 }
  0x1a   : > { %p545_p8 = pnand %p544_p6, %p538_p2 }
  0x1c   : > { %548 = shalt.err (!%p545_p8)
}
  0x1d   : > { %457 = dma.hbm_to_vmem [thread:$0]  (!%p455_p11), %s828_s1, 64, %s145_s24, [#allocation7]  }
  0x1e   : > { %s27_s30 = sadd.s32 1, %s655_s16  ;;  %s423_s4 = sshll.u32 %s158_s25, 3 }
  0x1f   : > { %p28_p4 = scmp.ge.s32.totalorder %s27_s30, 2  ;;  %s424_s5 = sshll.u32 %s655_s16, 6 }
  0x20   : > { %s162_s6 = scalar_lea.vmem [#allocation3], %s423_s4  ;;  %s170_s10 = scalar_lea.hbm %s827_s0, %s424_s5 }
  0x21   : > { %s171_s7 = sshll.u32 %s162_s6, 4  ;;  %s847_s30 = smov (%p28_p4, %s27_s30), 0  ;;  %s172_s7 = int_to_ptr.vmem [resolvable:$true] %s171_s7 }
  0x22   : > { %s35_s11 = ssub.s32 %s655_s16, %s847_s30  ;;  %s159_s23 = scalar_lea.sflag [#allocation4], %s158_s25 }
  0x23   : > { %p37_p6 = scmp.eq.s32.totalorder %s35_s11, 0  ;;  %p551_p8 = pneg %p748_p12 }
  0x24   : > { %s562_s24 = scalar_lea.vmem %s172_s7, 128  ;;  %s662_s27 = smov [#allocation3]  }
  0x25   : > { %s767_s12 = scalar_select %p37_p6, %s647_s14, %s39_s19  }
  0x26   : > { %p563_p9 = scmp.ne.s32.totalorder %s172_s7, %s562_s24  ;;  %s567_s28 = sshll.u32 %s662_s27, 4  ;;  %s568_s28 = int_to_ptr.vmem [resolvable:$false] %s567_s28 }
  0x27   : > { %s569_s29 = scalar_lea.vmem %s568_s28, 256  ;;  %p570_p13 = scmp.lt.s32.totalorder %s172_s7, %s568_s28 }
  0x28   : > { %p565_p10 = pnand %p563_p9, %p551_p8  ;;  %p571_p0 = scmp.lt.s32.totalorder %s569_s29, %s562_s24 }
  0x2a   : > { %p566_p11 = pneg %p565_p10  ;;  %p572_p1 = por %p571_p0, %p570_p13 }
  0x2c   : > { %p573_p2 = pnand %p572_p1, %p566_p11 }
  0x2e   : > { %576 = shalt.err (!%p573_p2)
}
  0x2f   : > { %s663_s4 = smov 128   ;;  %s664_s19 = smov 64  }
  0x30   : > { %s665_s5 = smov 4   ;;  %p837_p5 = scmp.ne.s32.totalorder %s835_s22, 0 }
  0x31   : > { %461 = dma.hbm_to_vmem [thread:$0]  (!%p748_p12), %s170_s10, 128, %s172_s7, %s159_s23, %s663_s4, %s664_s19, %s665_s5  }
  0x32   : > { %183 = sbr.rel (%p837_p5) target bundleno = 435 (0x1b3), region = 32  ;;  %s185_s25 = sand.u32 (!%p837_p5), 1, %s643_s13  }
  0x33   : > { %s426_s6 = sshll.u32 (!%p837_p5), %s185_s25, 3  ;;  %s186_s8 = scalar_lea.sflag (!%p837_p5), [#allocation4], %s185_s25 }
  0x34   : > { %s189_s9 = scalar_lea.vmem (!%p837_p5), [#allocation3], %s426_s6  ;;  %p838_p7 = scmp.ne.s32.totalorder (!%p837_p5), %s834_s21, 0 }
  0x37   : > { %626 = dma.done.wait (%p838_p7), %s186_s8, 128  }
  0x38   : > { %628 = vsyncadd (%p838_p7), %s186_s8, 4294967168 }
  0x39   : > { %630 = dma.done.wait (%p726_p3), [#allocation7], 64  }
  0x3a   : > { %632 = vsyncadd (%p726_p3), [#allocation7], 4294967232  ;;  %p428_p12 = scmp.ne.s32.totalorder %s651_s15, 0 }
  0x3c   : > { %215 = sbr.rel (%p428_p12) target bundleno = 67 (0x43), region = 44 }
  0x41   : > { %vm216_vm0 = vcmask 25600   ;;  %v666_v0 = vmov 0.0  }
  0x42   : > { %217 = vst.msk [vmem:[#allocation2] sm:$0x3] %vm216_vm0, %v666_v0 }
  0x43 PF: > { %v219_v1 = vld [vmem:[%s189_s9] sm:$0xf]  ;;  %vm221_vm1 = vcmask 1043456   ;;  %v220_v2 = vld [vmem:[%s189_s9 + $0x4] sm:$0xf]  ;;  %v230_v5 = vlaneseq  ;;  %vm240_vm2 = vcmask 1041409  }
  0x44   : > { %v222_v3 = vsel %vm221_vm1, %v219_v1, 0.0  ;;  %v225_v4 = vsel %vm221_vm1, %v220_v2, 0.0  ;;  %vm244_vm3 = vcmask 25600   ;;  %p429_p3 = scmp.ne.s32.totalorder %s651_s15, 1 }
  0x45   : > { %223 = vadd.xlane.f32.xlu0 %v222_v3  ;;  %v231_v6 = vand.u32 127, %v230_v5  ;;  %v233_v7 = vshrl.u32 %v230_v5, 7 }
  0x47   : > { %v234_v9 = vsub.s32 %v231_v6, %v233_v7 }
  0x49   : > { %226 = vadd.xlane.f32.xlu0 %v225_v4  ;;  %v218_v12 = vld [vmem:[#allocation2] sm:$0x3] }
  0xce   : > { %v224_v8 = vpop.xlane.xlu0 %223 }
  0xcf   : > { %v235_v11 = vrot.slane %v224_v8, %v234_v9 }
  0xd2   : > { %v227_v10 = vpop.xlane.xlu0 %226 }
  0xd3   : > { %v239_v13 = vrot.slane %v227_v10, %v234_v9 }
  0xd4   : > { %249 = sbr.rel (%p429_p3) target bundleno = 420 (0x1a4), region = 48 }
  0xd5   : > { %v241_v14 = vsel %vm240_vm2, %v239_v13, %v235_v11 }
  0xd6   : > { %v243_v15 = vadd.f32 %v241_v14, %v218_v12 }
  0xd8   : > { %245 = vst.msk [vmem:[#allocation2] sm:$0x3] %vm244_vm3, %v243_v15 }
  0xd9   : > { %v251_v16 = vld [vmem:[#allocation6] sm:$0xf]  ;;  %v667_v18 = vmov 0.0   ;;  %vm668_vm4 = vmmov 0   ;;  %vm259_vm5 = vcmask 31744  }
  0xda   : > { %439 = vmatprep.subr.mxu0 %v667_v18  ;;  %441 = vmatprep.mubr.msk.f32.mxu0 %vm668_vm4, %v667_v18  ;;  %v430_v19 = vld [vmem:[%s829_s2] ss:$0 sm:$0xff] }
  0xdb   : > { %440 = vmatpush3.msk.msra.mxu0 %vm221_vm1, %v251_v16 }
  0xdf   : > { %v250_v17 = vld [vmem:[#allocation2] sm:$0x3] }
  0xe0   : > { %442 = vmatmul.mubr.msk.f32.vlgmr.msra.gmra.mxu0 %vm259_vm5, %v250_v17 }
 0x1a0   : > { %v332_v20 = vpop.f32.mrf.mxu0 }
 0x1a1   : > { %v333_v21 = vadd.f32 %v430_v19, %v332_v20 }
 0x1a2   : > { %v443_v22 = vpop.f32.mrf.mxu0 }
 0x1a3   : > { %336 = vst [vmem:[#allocation8] sm:$0x3] %v333_v21 }
 0x1a4 PF: > { %p794_p4 = scmp.eq.s32.totalorder %s419_s18, 1  ;;  %s669_s22 = smov [#allocation8]  }
 0x1a5   : > { %s346_s26 = sshll.u32 %s669_s22, 4  ;;  %s347_s26 = int_to_ptr.vmem [resolvable:$true] %s346_s26 }
 0x1a6   : > { %s577_s7 = scalar_lea.vmem %s347_s26, 32  ;;  %p584_p10 = scmp.lt.s32.totalorder %s347_s26, %s347_s26 }
 0x1a7   : > { %p578_p6 = scmp.ne.s32.totalorder %s347_s26, %s577_s7  ;;  %p585_p11 = scmp.lt.s32.totalorder %s577_s7, %s577_s7 }
 0x1a9   : > { %p579_p8 = pnand %p578_p6, %p794_p4  ;;  %p586_p13 = por %p585_p11, %p584_p10 }
 0x1ab   : > { %p580_p9 = pneg %p579_p8 }
 0x1ad   : > { %p587_p0 = pnand %p586_p13, %p580_p9 }
 0x1af   : > { %590 = shalt.err (!%p587_p0)
}
 0x1b0   : > { %451 = dma.vmem_to_hbm [thread:$0]  (%p794_p4), %s347_s26, 32, %s830_s3, [#allocation5]  }
 0x1b1   : > { %634 = dma.done.wait (%p794_p4), [#allocation5], 32  }
 0x1b2   : > { %636 = vsyncadd (%p794_p4), [#allocation5], 4294967264 }
 0x1b3 PF: > { %s18_s17 = sadd.s32 1, %s659_s17   ;;  %s840_s11 = smov %s767_s12 }
 0x1b4   : > { %p15_p1 = scmp.ge.s32.totalorder %s18_s17, 4   ;;  %s841_s12 = smov %s643_s13 }
 0x1b5   : > { %s842_s13 = smov %s647_s14  ;;  %s843_s14 = smov %s840_s11 }
 0x1b6   : > { %s844_s15 = smov %s655_s16  ;;  %s845_s16 = smov %s847_s30 }
 0x1b7   :  { %17 = sbr.rel (!%p15_p1) target bundleno = 6 (0x6), region = 82 }
 0x1bc   :  { %359 = vsyncpa [#allocation4], 1 }
 0x1bd   :  { %361 = vsyncpa [#allocation4 + $0x1], 1 }
 0x1be   :  { %362 = vsyncpa [#allocation7], 1 }
 0x1bf   :  { %363 = vsyncpa [#allocation5], 1 }
 0x1c0   :  { %365 = vsyncpa [#allocation5 + $0x1], 1 }

</bundles_post_ra>
